<compile_context>
chip_gen: v5e
topology: v5e:2x2
jax: 0.10.0
libtpu: 0.0.40
codegen_flags: <defaults>
</compile_context>

<pallas_src>
from functools import partial

import jax
import jax.numpy as jnp
from jax.experimental import pallas as pl
from jax.experimental.pallas import tpu as pltpu

IN_DIM = 512
H1_DIM = 128
H2_DIM = 256
LATENT_DIM = 6
PROJ_DIM = 128
BN_EPS = 1e-5
LEAKY_SLOPE = 0.01          # nn.LeakyReLU default negative_slope
DEFAULT_BLOCK_B = 512       # batch rows per pipelined tile (multiple of 8)


# ----------------------------------------------------------------------------
# Shared in-kernel math helpers
# ----------------------------------------------------------------------------
def _leaky(x):
    return jnp.where(x > 0, x, LEAKY_SLOPE * x)


def _valid_row_mask(block_b, n_valid):
    """(1, block_b) f32 mask: 1.0 for rows < n_valid (handles padded last tile)."""
    rows = jax.lax.broadcasted_iota(jnp.int32, (1, block_b), 1)
    return (rows < n_valid).astype(jnp.float32)


def _masked_stats(h, m):
    """Per-feature sum / sum-of-squares over valid rows via MXU matmuls.

    Review item: avoids cross-sublane VPU/XLU reductions that grow with the
    tile height; the partial-tile row mask is folded into the lhs for free.
    """
    s1 = jnp.dot(m, h, preferred_element_type=jnp.float32)
    s2 = jnp.dot(m, h * h, preferred_element_type=jnp.float32)
    return s1, s2


def _bn_leaky_from_stats(h, s1, s2, count, gamma, beta):
    """Training-mode BatchNorm1d + LeakyReLU from per-feature sums (single pass)."""
    inv_n = 1.0 / count
    mean = s1 * inv_n
    var = jnp.maximum(s2 * inv_n - mean * mean, 0.0)   # clamp: one-pass variance
    scale = gamma * jax.lax.rsqrt(var + BN_EPS)        # rsqrt -> EUP slot
    shift = beta - mean * scale
    return _leaky(h * scale + shift)


def _heads_and_proj(h2, eps, whl, bhl, wfold, bfold, wp1, wp2, bp2):
    """Fused latent heads + reparameterization + projection head.

    Exact fold (review item): with W_fold = Wm @ Wp1, b_fold = bm @ Wp1 + bp1,
        z @ Wp1 + bp1 = h2 @ W_fold + (eps * exp(0.5*logvar)) @ Wp1 + b_fold
    which removes the lane-misaligned mu/logvar slicing and turns the mu head
    into a lane-dense (256,128) MXU matmul.
    """
    # TODO(synk): eps could be generated in-kernel via pltpu.prng_seed /
    # stateful_normal; kept as an explicit input for parity with torch.randn_like.
    half_logvar = jnp.dot(h2, whl, preferred_element_type=jnp.float32) + bhl   # (B, 6)
    noise = jnp.dot(eps * jnp.exp(half_logvar), wp1,
                    preferred_element_type=jnp.float32)                         # (B, 128)
    p1 = _leaky(jnp.dot(h2, wfold, preferred_element_type=jnp.float32) + noise + bfold)
    return jnp.dot(p1, wp2, preferred_element_type=jnp.float32) + bp2           # (B, 6)


# ----------------------------------------------------------------------------
# Path A: whole-batch fused kernel (single launch, no h1/h2 HBM round trip).
# Used when the batch fits in one tile.
# ----------------------------------------------------------------------------
def _fused_kernel(x_ref, eps_ref,
                  w1_ref, g1_ref, be1_ref,
                  w2_ref, g2_ref, be2_ref,
                  whl_ref, bhl_ref, wfold_ref, bfold_ref,
                  wp1_ref, wp2_ref, bp2_ref,
                  out_ref):
    x = x_ref[...]
    count = x.shape[0]
    ones = jnp.ones((1, count), jnp.float32)

    # Linear biases omitted: cancelled exactly by training-mode BN mean subtraction.
    h1 = jnp.dot(x, w1_ref[...], preferred_element_type=jnp.float32)
    s1, s2 = _masked_stats(h1, ones)
    h1 = _bn_leaky_from_stats(h1, s1, s2, count, g1_ref[...], be1_ref[...])

    h2 = jnp.dot(h1, w2_ref[...], preferred_element_type=jnp.float32)
    s1, s2 = _masked_stats(h2, ones)
    h2 = _bn_leaky_from_stats(h2, s1, s2, count, g2_ref[...], be2_ref[...])

    out = _heads_and_proj(h2, eps_ref[...], whl_ref[...], bhl_ref[...],
                          wfold_ref[...], bfold_ref[...],
                          wp1_ref[...], wp2_ref[...], bp2_ref[...])
    out_ref[...] = out.astype(out_ref.dtype)


# ----------------------------------------------------------------------------
# Path B: batch-tiled 3-stage pipeline.  Training-mode BN needs whole-batch
# statistics, so each stage streams batch tiles, spills its pre-activation to
# HBM and writes per-tile partial stats; the (2,F) scale/shift fold between
# stages is a tiny JAX op.  All grid axes are "parallel" (per-tile outputs
# only) -> v7x megacore splits the batch across both TensorCores.
# ----------------------------------------------------------------------------
def _stage1_kernel(x_ref, w1_ref, h1_ref, stat_ref, *, batch, block_b):
    t = pl.program_id(0)
    h = jnp.dot(x_ref[...], w1_ref[...], preferred_element_type=jnp.float32)
    h1_ref[...] = h
    m = _valid_row_mask(block_b, batch - t * block_b)
    s1, s2 = _masked_stats(h, m)
    stat_ref[0] = jnp.concatenate([s1, s2], axis=0)


def _stage2_kernel(h1_ref, ss1_ref, w2_ref, h2_ref, stat_ref, *, batch, block_b):
    t = pl.program_id(0)
    h1 = _leaky(h1_ref[...] * ss1_ref[0:1, :] + ss1_ref[1:2, :])
    h = jnp.dot(h1, w2_ref[...], preferred_element_type=jnp.float32)
    h2_ref[...] = h
    m = _valid_row_mask(block_b, batch - t * block_b)
    s1, s2 = _masked_stats(h, m)
    stat_ref[0] = jnp.concatenate([s1, s2], axis=0)


def _stage3_kernel(h2_ref, ss2_ref, eps_ref,
                   whl_ref, bhl_ref, wfold_ref, bfold_ref,
                   wp1_ref, wp2_ref, bp2_ref, out_ref):
    h2 = _leaky(h2_ref[...] * ss2_ref[0:1, :] + ss2_ref[1:2, :])
    out = _heads_and_proj(h2, eps_ref[...], whl_ref[...], bhl_ref[...],
                          wfold_ref[...], bfold_ref[...],
                          wp1_ref[...], wp2_ref[...], bp2_ref[...])
    out_ref[...] = out.astype(out_ref.dtype)


# ----------------------------------------------------------------------------
# Host-side helpers
# ----------------------------------------------------------------------------
def _scale_shift(stats, count, gamma, beta):
    """Combine per-tile partial sums into a folded (scale, shift) pair: (2, F)."""
    s = jnp.sum(stats, axis=0)                                 # (2, F)
    mean = s[0:1] / count
    var = jnp.maximum(s[1:2] / count - mean * mean, 0.0)
    scale = gamma * jax.lax.rsqrt(var + BN_EPS)
    shift = beta - mean * scale
    return jnp.concatenate([scale, shift], axis=0)


def _compiler_params(grid_rank, resident_bytes):
    """Megacore semantics + VMEM request sized to residency (v7x: 64 MiB/TC)."""
    return pltpu.CompilerParams(
        dimension_semantics=(("parallel",) * grid_rank) if grid_rank else None,
        vmem_limit_bytes=min(int(resident_bytes) + (8 << 20), 60 << 20),
    )


def prepare_params(p):
    """One-time algebraic pre-folds (hoisted out of the per-call forward).

    * b1/b2 dropped: exact under training-mode BatchNorm (mean subtraction
      cancels per-feature constants).
    * whl/bhl carry the 0.5 reparameterization factor (exp(h2@whl+bhl) = std).
    * wfold/bfold fold the mu head through the first projection layer.
    NOTE: valid only for BatchNorm in *training* mode (batch statistics).
    """
    wfold = jnp.dot(p["wm"], p["wp1"])                  # (256, 128)
    bfold = jnp.dot(p["bm"], p["wp1"]) + p["bp1"]       # (1, 128)
    return dict(
        w1=p["w1"], g1=p["g1"], be1=p["be1"],
        w2=p["w2"], g2=p["g2"], be2=p["be2"],
        whl=0.5 * p["wv"], bhl=0.5 * p["bv"],
        wfold=wfold, bfold=bfold,
        wp1=p["wp1"], wp2=p["wp2"], bp2=p["bp2"],
    )


# ----------------------------------------------------------------------------
# Forward wrappers
# ----------------------------------------------------------------------------
@jax.jit
def _forward_fused(x, eps, p):
    B = x.shape[0]
    args = (x, eps,
            p["w1"], p["g1"], p["be1"],
            p["w2"], p["g2"], p["be2"],
            p["whl"], p["bhl"], p["wfold"], p["bfold"],
            p["wp1"], p["wp2"], p["bp2"])
    vmem = pl.BlockSpec(memory_space=pltpu.MemorySpace.VMEM)

    weight_elems = (IN_DIM * H1_DIM + H1_DIM * H2_DIM
                    + H2_DIM * (LATENT_DIM + PROJ_DIM)
                    + LATENT_DIM * PROJ_DIM + PROJ_DIM * LATENT_DIM
                    + 2 * (H1_DIM + H2_DIM) + PROJ_DIM + 2 * LATENT_DIM)
    act_elems = B * (IN_DIM + H1_DIM + H2_DIM + PROJ_DIM + 3 * LATENT_DIM)
    resident = 4 * (weight_elems + act_elems)
    flops = 2 * B * (IN_DIM * H1_DIM + H1_DIM * H2_DIM
                     + H2_DIM * (LATENT_DIM + PROJ_DIM)
                     + LATENT_DIM * PROJ_DIM + PROJ_DIM * LATENT_DIM)
    return pl.pallas_call(
        _fused_kernel,
        out_shape=jax.ShapeDtypeStruct((B, LATENT_DIM), jnp.float32),
        in_specs=[vmem] * len(args),
        out_specs=vmem,
        compiler_params=_compiler_params(0, resident),
        cost_estimate=pl.CostEstimate(
            flops=flops,
            transcendentals=B * LATENT_DIM + H1_DIM + H2_DIM,
            bytes_accessed=resident),
    )(*args)


@partial(jax.jit, static_argnames=("block_b",))
def _forward_tiled(x, eps, p, *, block_b):
    B = x.shape[0]
    n_tiles = pl.cdiv(B, block_b)
    b_pad = n_tiles * block_b
    if b_pad != B:
        # Zero-pad so padded rows are well-defined; stats use the row mask.
        x = jnp.pad(x, ((0, b_pad - B), (0, 0)))
        eps = jnp.pad(eps, ((0, b_pad - B), (0, 0)))

    row = lambda t: (t, 0)
    fixed = lambda t: (0, 0)

    # --- stage 1: h1_pre = x @ W1, per-tile BN1 partial stats ---------------
    tile_bytes = 4 * block_b * (IN_DIM + H1_DIM)
    h1_pre, stat1 = pl.pallas_call(
        partial(_stage1_kernel, batch=B, block_b=block_b),
        grid=(n_tiles,),
        in_specs=[pl.BlockSpec((block_b, IN_DIM), row),
                  pl.BlockSpec((IN_DIM, H1_DIM), fixed)],
        out_specs=[pl.BlockSpec((block_b, H1_DIM), row),
                   pl.BlockSpec((1, 2, H1_DIM), lambda t: (t, 0, 0))],
        out_shape=[jax.ShapeDtypeStruct((b_pad, H1_DIM), jnp.float32),
                   jax.ShapeDtypeStruct((n_tiles, 2, H1_DIM), jnp.float32)],
        compiler_params=_compiler_params(1, 2 * tile_bytes + 4 * IN_DIM * H1_DIM),
        cost_estimate=pl.CostEstimate(
            flops=2 * b_pad * H1_DIM * (IN_DIM + 2),
            transcendentals=0,
            bytes_accessed=4 * (b_pad * (IN_DIM + H1_DIM) + IN_DIM * H1_DIM)),
    )(x, p["w1"])
    ss1 = _scale_shift(stat1, B, p["g1"], p["be1"])

    # --- stage 2: BN1 + LeakyReLU, h2_pre = h1 @ W2, per-tile BN2 stats ------
    tile_bytes = 4 * block_b * (H1_DIM + H2_DIM)
    h2_pre, stat2 = pl.pallas_call(
        partial(_stage2_kernel, batch=B, block_b=block_b),
        grid=(n_tiles,),
        in_specs=[pl.BlockSpec((block_b, H1_DIM), row),
                  pl.BlockSpec((2, H1_DIM), fixed),
                  pl.BlockSpec((H1_DIM, H2_DIM), fixed)],
        out_specs=[pl.BlockSpec((block_b, H2_DIM), row),
                   pl.BlockSpec((1, 2, H2_DIM), lambda t: (t, 0, 0))],
        out_shape=[jax.ShapeDtypeStruct((b_pad, H2_DIM), jnp.float32),
                   jax.ShapeDtypeStruct((n_tiles, 2, H2_DIM), jnp.float32)],
        compiler_params=_compiler_params(1, 2 * tile_bytes + 4 * H1_DIM * H2_DIM),
        cost_estimate=pl.CostEstimate(
            flops=2 * b_pad * H2_DIM * (H1_DIM + 2),
            transcendentals=0,
            bytes_accessed=4 * (b_pad * (H1_DIM + H2_DIM) + H1_DIM * H2_DIM)),
    )(h1_pre, ss1, p["w2"])
    ss2 = _scale_shift(stat2, B, p["g2"], p["be2"])

    # --- stage 3: BN2 + LeakyReLU, latent heads, reparam, projection --------
    tile_bytes = 4 * block_b * (H2_DIM + 2 * LATENT_DIM)
    weight_bytes = 4 * (H2_DIM * (LATENT_DIM + PROJ_DIM) + LATENT_DIM * PROJ_DIM
                        + PROJ_DIM * LATENT_DIM + PROJ_DIM + 2 * LATENT_DIM + 2 * H2_DIM)
    out = pl.pallas_call(
        _stage3_kernel,
        grid=(n_tiles,),
        in_specs=[pl.BlockSpec((block_b, H2_DIM), row),
                  pl.BlockSpec((2, H2_DIM), fixed),
                  pl.BlockSpec((block_b, LATENT_DIM), row),
                  pl.BlockSpec((H2_DIM, LATENT_DIM), fixed),
                  pl.BlockSpec((1, LATENT_DIM), fixed),
                  pl.BlockSpec((H2_DIM, PROJ_DIM), fixed),
                  pl.BlockSpec((1, PROJ_DIM), fixed),
                  pl.BlockSpec((LATENT_DIM, PROJ_DIM), fixed),
                  pl.BlockSpec((PROJ_DIM, LATENT_DIM), fixed),
                  pl.BlockSpec((1, LATENT_DIM), fixed)],
        out_specs=pl.BlockSpec((block_b, LATENT_DIM), row),
        out_shape=jax.ShapeDtypeStruct((b_pad, LATENT_DIM), jnp.float32),
        compiler_params=_compiler_params(1, 2 * tile_bytes + weight_bytes),
        cost_estimate=pl.CostEstimate(
            flops=2 * b_pad * (H2_DIM * (LATENT_DIM + PROJ_DIM)
                               + LATENT_DIM * PROJ_DIM + PROJ_DIM * LATENT_DIM),
            transcendentals=b_pad * LATENT_DIM,
            bytes_accessed=4 * b_pad * (H2_DIM + 3 * LATENT_DIM) + weight_bytes),
    )(h2_pre, ss2, eps, p["whl"], p["bhl"], p["wfold"], p["bfold"],
      p["wp1"], p["wp2"], p["bp2"])

    return out[:B]


def cvae_jetclass_forward(x, eps, folded_params, *, block_b=DEFAULT_BLOCK_B):
    """x: (B, 512) f32; eps: (B, 6) f32 reparam noise; folded_params from prepare_params()."""
    block_b = max(8, (block_b // 8) * 8)
    if x.shape[0] <= block_b:
        return _forward_fused(x, eps, folded_params)
    return _forward_tiled(x, eps, folded_params, block_b=block_b)


# ----------------------------------------------------------------------------
# Parameter init + pure-JAX reference (mirrors the PyTorch forward exactly,
# including b1/b2 and two-pass BN, to prove the in-kernel folds are exact).
# ----------------------------------------------------------------------------
def init_params(key):
    keys = jax.random.split(key, 12)

    def lin(k, fan_in, fan_out):
        # weights stored as (in, out) = transpose of PyTorch's (out, in)
        bound = 1.0 / jnp.sqrt(fan_in)
        kw, kb = jax.random.split(k)
        w = jax.random.uniform(kw, (fan_in, fan_out), jnp.float32, -bound, bound)
        b = jax.random.uniform(kb, (1, fan_out), jnp.float32, -bound, bound)
        return w, b

    w1, b1 = lin(keys[0], IN_DIM, H1_DIM)
    w2, b2 = lin(keys[1], H1_DIM, H2_DIM)
    wm, bm = lin(keys[2], H2_DIM, LATENT_DIM)
    wv, bv = lin(keys[3], H2_DIM, LATENT_DIM)
    wp1, bp1 = lin(keys[4], LATENT_DIM, PROJ_DIM)
    wp2, bp2 = lin(keys[5], PROJ_DIM, LATENT_DIM)

    g1 = 1.0 + 0.1 * jax.random.normal(keys[6], (1, H1_DIM), jnp.float32)
    be1 = 0.1 * jax.random.normal(keys[7], (1, H1_DIM), jnp.float32)
    g2 = 1.0 + 0.1 * jax.random.normal(keys[8], (1, H2_DIM), jnp.float32)
    be2 = 0.1 * jax.random.normal(keys[9], (1, H2_DIM), jnp.float32)

    return dict(
        w1=w1, b1=b1, g1=g1, be1=be1,
        w2=w2, b2=b2, g2=g2, be2=be2,
        wm=wm, bm=bm, wv=wv, bv=bv,
        wp1=wp1, bp1=bp1, wp2=wp2, bp2=bp2,
    )


def _bn_ref(x, gamma, beta):
    mean = jnp.mean(x, axis=0, keepdims=True)
    var = jnp.mean((x - mean) ** 2, axis=0, keepdims=True)
    return (x - mean) * jax.lax.rsqrt(var + BN_EPS) * gamma + beta


def reference_forward(x, eps, p):
    h1 = _leaky(_bn_ref(x @ p["w1"] + p["b1"], p["g1"], p["be1"]))
    h2 = _leaky(_bn_ref(h1 @ p["w2"] + p["b2"], p["g2"], p["be2"]))
    mu = h2 @ p["wm"] + p["bm"]
    logvar = h2 @ p["wv"] + p["bv"]
    z = eps * jnp.exp(0.5 * logvar) + mu
    p1 = _leaky(z @ p["wp1"] + p["bp1"])
    return p1 @ p["wp2"] + p["bp2"]


if __name__ == "__main__":
    key = jax.random.PRNGKey(0)
    k_params, k_x1, k_e1, k_x2, k_e2 = jax.random.split(key, 5)
    params = init_params(k_params)
    folded = prepare_params(params)       # one-time pre-folds (hoisted, per review)

    # Path A: small whole-batch fused single-launch kernel.
    B1 = 8
    x1 = jax.random.normal(k_x1, (B1, IN_DIM), jnp.float32)
    e1 = jax.random.normal(k_e1, (B1, LATENT_DIM), jnp.float32)
    out1 = jax.block_until_ready(cvae_jetclass_forward(x1, e1, folded))
    ref1 = reference_forward(x1, e1, params)
    assert out1.shape == (B1, LATENT_DIM)
    assert jnp.allclose(out1, ref1, atol=2e-4, rtol=2e-4), (
        f"fused path: max abs diff {jnp.max(jnp.abs(out1 - ref1))}"
    )

    # Path B: larger, non-multiple-of-8 batch exercising the tiled 3-stage
    # pipeline (small tile on purpose so multiple grid steps + a padded tile run).
    B2 = 83
    x2 = jax.random.normal(k_x2, (B2, IN_DIM), jnp.float32)
    e2 = jax.random.normal(k_e2, (B2, LATENT_DIM), jnp.float32)
    out2 = jax.block_until_ready(cvae_jetclass_forward(x2, e2, folded, block_b=32))
    ref2 = reference_forward(x2, e2, params)
    assert out2.shape == (B2, LATENT_DIM)
    assert jnp.allclose(out2, ref2, atol=2e-4, rtol=2e-4), (
        f"tiled path: max abs diff {jnp.max(jnp.abs(out2 - ref2))}"
    )

    print("KERNEL_OK")
</pallas_src>

<mosaic_0001>
module attributes {stable_mosaic.version = 11 : i64} {
  func.func @_fused_kernel(%arg0: memref<8x512xf32, #tpu.memory_space<vmem>>, %arg1: memref<8x6xf32, #tpu.memory_space<vmem>>, %arg2: memref<512x128xf32, #tpu.memory_space<vmem>>, %arg3: memref<1x128xf32, #tpu.memory_space<vmem>>, %arg4: memref<1x128xf32, #tpu.memory_space<vmem>>, %arg5: memref<128x256xf32, #tpu.memory_space<vmem>>, %arg6: memref<1x256xf32, #tpu.memory_space<vmem>>, %arg7: memref<1x256xf32, #tpu.memory_space<vmem>>, %arg8: memref<256x6xf32, #tpu.memory_space<vmem>>, %arg9: memref<1x6xf32, #tpu.memory_space<vmem>>, %arg10: memref<256x128xf32, #tpu.memory_space<vmem>>, %arg11: memref<1x128xf32, #tpu.memory_space<vmem>>, %arg12: memref<6x128xf32, #tpu.memory_space<vmem>>, %arg13: memref<128x6xf32, #tpu.memory_space<vmem>>, %arg14: memref<1x6xf32, #tpu.memory_space<vmem>>, %arg15: memref<8x6xf32, #tpu.memory_space<vmem>>) attributes {dimension_semantics = [], scalar_prefetch = 0 : i64, scratch_operands = 0 : i64, tpu.core_type = #tpu.core_type<tc>} {
    %c0 = arith.constant 0 : index
    %c0_0 = arith.constant 0 : index
    %0 = vector.load %arg0[%c0, %c0_0] : memref<8x512xf32, #tpu.memory_space<vmem>>, vector<8x512xf32>
    %cst = arith.constant 1.000000e+00 : f32
    %1 = vector.broadcast %cst : f32 to vector<1x8xf32>
    %c0_1 = arith.constant 0 : index
    %c0_2 = arith.constant 0 : index
    %2 = vector.load %arg2[%c0_1, %c0_2] : memref<512x128xf32, #tpu.memory_space<vmem>>, vector<512x128xf32>
    %cst_3 = arith.constant dense<0.000000e+00> : vector<8x128xf32>
    %3 = tpu.matmul %0, %2, %cst_3 {dimension_numbers = #tpu.dot_dimension_numbers<[1], [0], [0], [1], [0, 0, 1, 1], [], []>} : vector<8x512xf32>, vector<512x128xf32>, vector<8x128xf32> -> vector<8x128xf32>
    %cst_4 = arith.constant dense<0.000000e+00> : vector<1x128xf32>
    %4 = tpu.matmul %1, %3, %cst_4 {dimension_numbers = #tpu.dot_dimension_numbers<[1], [0], [0], [1], [0, 0, 1, 1], [], []>} : vector<1x8xf32>, vector<8x128xf32>, vector<1x128xf32> -> vector<1x128xf32>
    %5 = arith.mulf %3, %3 : vector<8x128xf32>
    %cst_5 = arith.constant dense<0.000000e+00> : vector<1x128xf32>
    %6 = tpu.matmul %1, %5, %cst_5 {dimension_numbers = #tpu.dot_dimension_numbers<[1], [0], [0], [1], [0, 0, 1, 1], [], []>} : vector<1x8xf32>, vector<8x128xf32>, vector<1x128xf32> -> vector<1x128xf32>
    %c0_6 = arith.constant 0 : index
    %c0_7 = arith.constant 0 : index
    %7 = vector.load %arg3[%c0_6, %c0_7] : memref<1x128xf32, #tpu.memory_space<vmem>>, vector<1x128xf32>
    %c0_8 = arith.constant 0 : index
    %c0_9 = arith.constant 0 : index
    %8 = vector.load %arg4[%c0_8, %c0_9] : memref<1x128xf32, #tpu.memory_space<vmem>>, vector<1x128xf32>
    %cst_10 = arith.constant 1.250000e-01 : f32
    %9 = vector.broadcast %cst_10 : f32 to vector<1x128xf32>
    %10 = arith.mulf %4, %9 : vector<1x128xf32>
    %cst_11 = arith.constant 1.250000e-01 : f32
    %11 = vector.broadcast %cst_11 : f32 to vector<1x128xf32>
    %12 = arith.mulf %6, %11 : vector<1x128xf32>
    %13 = arith.mulf %10, %10 : vector<1x128xf32>
    %14 = arith.subf %12, %13 : vector<1x128xf32>
    %cst_12 = arith.constant 0.000000e+00 : f32
    %15 = vector.broadcast %cst_12 : f32 to vector<1x128xf32>
    %16 = arith.maximumf %14, %15 : vector<1x128xf32>
    %cst_13 = arith.constant 9.99999974E-6 : f32
    %17 = vector.broadcast %cst_13 : f32 to vector<1x128xf32>
    %18 = arith.addf %16, %17 : vector<1x128xf32>
    %19 = math.rsqrt %18 : vector<1x128xf32>
    %20 = arith.mulf %7, %19 : vector<1x128xf32>
    %21 = arith.mulf %10, %20 : vector<1x128xf32>
    %22 = arith.subf %8, %21 : vector<1x128xf32>
    %23 = vector.broadcast %20 : vector<1x128xf32> to vector<8x128xf32>
    %24 = arith.mulf %3, %23 : vector<8x128xf32>
    %25 = vector.broadcast %22 : vector<1x128xf32> to vector<8x128xf32>
    %26 = arith.addf %24, %25 : vector<8x128xf32>
    %cst_14 = arith.constant 0.000000e+00 : f32
    %27 = vector.broadcast %cst_14 : f32 to vector<8x128xf32>
    %28 = arith.cmpf ogt, %26, %27 : vector<8x128xf32>
    %cst_15 = arith.constant 0.00999999977 : f32
    %29 = vector.broadcast %cst_15 : f32 to vector<8x128xf32>
    %30 = arith.mulf %29, %26 : vector<8x128xf32>
    %31 = arith.select %28, %26, %30 : vector<8x128xi1>, vector<8x128xf32>
    %c0_16 = arith.constant 0 : index
    %c0_17 = arith.constant 0 : index
    %32 = vector.load %arg5[%c0_16, %c0_17] : memref<128x256xf32, #tpu.memory_space<vmem>>, vector<128x256xf32>
    %cst_18 = arith.constant dense<0.000000e+00> : vector<8x256xf32>
    %33 = tpu.matmul %31, %32, %cst_18 {dimension_numbers = #tpu.dot_dimension_numbers<[1], [0], [0], [1], [0, 0, 1, 1], [], []>} : vector<8x128xf32>, vector<128x256xf32>, vector<8x256xf32> -> vector<8x256xf32>
    %cst_19 = arith.constant dense<0.000000e+00> : vector<1x256xf32>
    %34 = tpu.matmul %1, %33, %cst_19 {dimension_numbers = #tpu.dot_dimension_numbers<[1], [0], [0], [1], [0, 0, 1, 1], [], []>} : vector<1x8xf32>, vector<8x256xf32>, vector<1x256xf32> -> vector<1x256xf32>
    %35 = arith.mulf %33, %33 : vector<8x256xf32>
    %cst_20 = arith.constant dense<0.000000e+00> : vector<1x256xf32>
    %36 = tpu.matmul %1, %35, %cst_20 {dimension_numbers = #tpu.dot_dimension_numbers<[1], [0], [0], [1], [0, 0, 1, 1], [], []>} : vector<1x8xf32>, vector<8x256xf32>, vector<1x256xf32> -> vector<1x256xf32>
    %c0_21 = arith.constant 0 : index
    %c0_22 = arith.constant 0 : index
    %37 = vector.load %arg6[%c0_21, %c0_22] : memref<1x256xf32, #tpu.memory_space<vmem>>, vector<1x256xf32>
    %c0_23 = arith.constant 0 : index
    %c0_24 = arith.constant 0 : index
    %38 = vector.load %arg7[%c0_23, %c0_24] : memref<1x256xf32, #tpu.memory_space<vmem>>, vector<1x256xf32>
    %cst_25 = arith.constant 1.250000e-01 : f32
    %39 = vector.broadcast %cst_25 : f32 to vector<1x256xf32>
    %40 = arith.mulf %34, %39 : vector<1x256xf32>
    %cst_26 = arith.constant 1.250000e-01 : f32
    %41 = vector.broadcast %cst_26 : f32 to vector<1x256xf32>
    %42 = arith.mulf %36, %41 : vector<1x256xf32>
    %43 = arith.mulf %40, %40 : vector<1x256xf32>
    %44 = arith.subf %42, %43 : vector<1x256xf32>
    %cst_27 = arith.constant 0.000000e+00 : f32
    %45 = vector.broadcast %cst_27 : f32 to vector<1x256xf32>
    %46 = arith.maximumf %44, %45 : vector<1x256xf32>
    %cst_28 = arith.constant 9.99999974E-6 : f32
    %47 = vector.broadcast %cst_28 : f32 to vector<1x256xf32>
    %48 = arith.addf %46, %47 : vector<1x256xf32>
    %49 = math.rsqrt %48 : vector<1x256xf32>
    %50 = arith.mulf %37, %49 : vector<1x256xf32>
    %51 = arith.mulf %40, %50 : vector<1x256xf32>
    %52 = arith.subf %38, %51 : vector<1x256xf32>
    %53 = vector.broadcast %50 : vector<1x256xf32> to vector<8x256xf32>
    %54 = arith.mulf %33, %53 : vector<8x256xf32>
    %55 = vector.broadcast %52 : vector<1x256xf32> to vector<8x256xf32>
    %56 = arith.addf %54, %55 : vector<8x256xf32>
    %cst_29 = arith.constant 0.000000e+00 : f32
    %57 = vector.broadcast %cst_29 : f32 to vector<8x256xf32>
    %58 = arith.cmpf ogt, %56, %57 : vector<8x256xf32>
    %cst_30 = arith.constant 0.00999999977 : f32
    %59 = vector.broadcast %cst_30 : f32 to vector<8x256xf32>
    %60 = arith.mulf %59, %56 : vector<8x256xf32>
    %61 = arith.select %58, %56, %60 : vector<8x256xi1>, vector<8x256xf32>
    %c0_31 = arith.constant 0 : index
    %c0_32 = arith.constant 0 : index
    %62 = vector.load %arg1[%c0_31, %c0_32] : memref<8x6xf32, #tpu.memory_space<vmem>>, vector<8x6xf32>
    %c0_33 = arith.constant 0 : index
    %c0_34 = arith.constant 0 : index
    %63 = vector.load %arg8[%c0_33, %c0_34] : memref<256x6xf32, #tpu.memory_space<vmem>>, vector<256x6xf32>
    %c0_35 = arith.constant 0 : index
    %c0_36 = arith.constant 0 : index
    %64 = vector.load %arg9[%c0_35, %c0_36] : memref<1x6xf32, #tpu.memory_space<vmem>>, vector<1x6xf32>
    %c0_37 = arith.constant 0 : index
    %c0_38 = arith.constant 0 : index
    %65 = vector.load %arg10[%c0_37, %c0_38] : memref<256x128xf32, #tpu.memory_space<vmem>>, vector<256x128xf32>
    %c0_39 = arith.constant 0 : index
    %c0_40 = arith.constant 0 : index
    %66 = vector.load %arg11[%c0_39, %c0_40] : memref<1x128xf32, #tpu.memory_space<vmem>>, vector<1x128xf32>
    %c0_41 = arith.constant 0 : index
    %c0_42 = arith.constant 0 : index
    %67 = vector.load %arg12[%c0_41, %c0_42] : memref<6x128xf32, #tpu.memory_space<vmem>>, vector<6x128xf32>
    %c0_43 = arith.constant 0 : index
    %c0_44 = arith.constant 0 : index
    %68 = vector.load %arg13[%c0_43, %c0_44] : memref<128x6xf32, #tpu.memory_space<vmem>>, vector<128x6xf32>
    %c0_45 = arith.constant 0 : index
    %c0_46 = arith.constant 0 : index
    %69 = vector.load %arg14[%c0_45, %c0_46] : memref<1x6xf32, #tpu.memory_space<vmem>>, vector<1x6xf32>
    %cst_47 = arith.constant dense<0.000000e+00> : vector<8x6xf32>
    %70 = tpu.matmul %61, %63, %cst_47 {dimension_numbers = #tpu.dot_dimension_numbers<[1], [0], [0], [1], [0, 0, 1, 1], [], []>} : vector<8x256xf32>, vector<256x6xf32>, vector<8x6xf32> -> vector<8x6xf32>
    %71 = vector.broadcast %64 : vector<1x6xf32> to vector<8x6xf32>
    %72 = arith.addf %70, %71 : vector<8x6xf32>
    %73 = math.exp %72 : vector<8x6xf32>
    %74 = arith.mulf %62, %73 : vector<8x6xf32>
    %cst_48 = arith.constant dense<0.000000e+00> : vector<8x128xf32>
    %75 = tpu.matmul %74, %67, %cst_48 {dimension_numbers = #tpu.dot_dimension_numbers<[1], [0], [0], [1], [0, 0, 1, 1], [], []>} : vector<8x6xf32>, vector<6x128xf32>, vector<8x128xf32> -> vector<8x128xf32>
    %cst_49 = arith.constant dense<0.000000e+00> : vector<8x128xf32>
    %76 = tpu.matmul %61, %65, %cst_49 {dimension_numbers = #tpu.dot_dimension_numbers<[1], [0], [0], [1], [0, 0, 1, 1], [], []>} : vector<8x256xf32>, vector<256x128xf32>, vector<8x128xf32> -> vector<8x128xf32>
    %77 = arith.addf %76, %75 : vector<8x128xf32>
    %78 = vector.broadcast %66 : vector<1x128xf32> to vector<8x128xf32>
    %79 = arith.addf %77, %78 : vector<8x128xf32>
    %cst_50 = arith.constant 0.000000e+00 : f32
    %80 = vector.broadcast %cst_50 : f32 to vector<8x128xf32>
    %81 = arith.cmpf ogt, %79, %80 : vector<8x128xf32>
    %cst_51 = arith.constant 0.00999999977 : f32
    %82 = vector.broadcast %cst_51 : f32 to vector<8x128xf32>
    %83 = arith.mulf %82, %79 : vector<8x128xf32>
    %84 = arith.select %81, %79, %83 : vector<8x128xi1>, vector<8x128xf32>
    %cst_52 = arith.constant dense<0.000000e+00> : vector<8x6xf32>
    %85 = tpu.matmul %84, %68, %cst_52 {dimension_numbers = #tpu.dot_dimension_numbers<[1], [0], [0], [1], [0, 0, 1, 1], [], []>} : vector<8x128xf32>, vector<128x6xf32>, vector<8x6xf32> -> vector<8x6xf32>
    %86 = vector.broadcast %69 : vector<1x6xf32> to vector<8x6xf32>
    %87 = arith.addf %85, %86 : vector<8x6xf32>
    %c0_53 = arith.constant 0 : index
    %c0_54 = arith.constant 0 : index
    %88 = vector.load %arg15[%c0_53, %c0_54] : memref<8x6xf32, #tpu.memory_space<vmem>>, vector<8x6xf32>
    tpu.vector_store %arg15[%c0_53, %c0_54], %87 {strides = array<i32>} : memref<8x6xf32, #tpu.memory_space<vmem>>, vector<8x6xf32>,
    return
  }
}

</mosaic_0001>

<bundles_post_ra>
// kernel: _forward_fused.1
= control target key start
LH: loop header
LB: loop body
LE: loop exit
PB: predicated region body
PF: predicated region fallthrough
CT: control target
= control target key end

     0   :  { %20 = vsyncpa [#allocation3], 0  ;;  %s1310_s0 = inlined_call_operand.vmem [shape: f32[8,512], index: 0, kind: input, shape index: {}]   ;;  %s1311_s1 = inlined_call_operand.vmem [shape: f32[8,6], index: 1, kind: input, shape index: {}]   ;;  %s1312_s2 = inlined_call_operand.hbm [shape: f32[512,128], index: 2, kind: input, shape index: {}]   ;;  %s1313_s3 = inlined_call_operand.vmem [shape: f32[1,128], index: 3, kind: input, shape index: {}]   ;;  %s1314_s4 = inlined_call_operand.vmem [shape: f32[1,128], index: 4, kind: input, shape index: {}]   ;;  %s1315_s5 = inlined_call_operand.vmem [shape: f32[128,256], index: 5, kind: input, shape index: {}]   ;;  %s1316_s6 = inlined_call_operand.vmem [shape: f32[1,256], index: 6, kind: input, shape index: {}]   ;;  %s1317_s7 = inlined_call_operand.vmem [shape: f32[1,256], index: 7, kind: input, shape index: {}]   ;;  %s1318_s8 = inlined_call_operand.vmem [shape: f32[256,6], index: 8, kind: input, shape index: {}]   ;;  %s1319_s9 = inlined_call_operand.vmem [shape: f32[1,6], index: 9, kind: input, shape index: {}]   ;;  %s1320_s10 = inlined_call_operand.hbm [shape: f32[256,128], index: 10, kind: input, shape index: {}]   ;;  %s1321_s11 = inlined_call_operand.vmem [shape: f32[1,128], index: 11, kind: input, shape index: {}]   ;;  %s1322_s12 = inlined_call_operand.vmem [shape: f32[6,128], index: 12, kind: input, shape index: {}]   ;;  %s1323_s13 = inlined_call_operand.vmem [shape: f32[128,6], index: 13, kind: input, shape index: {}]   ;;  %s1324_s14 = inlined_call_operand.vmem [shape: f32[1,6], index: 14, kind: input, shape index: {}]   ;;  %s1325_s15 = inlined_call_operand.hbm [shape: f32[8,6], index: 15, kind: output, shape index: {}]  }
   0x1   :  { %21 = vsyncpa [#allocation6], 0 }
   0x2   :  { %22 = vsyncpa [#allocation4], 0  ;;  %s31_s20 = sshll.u32 %s1312_s2, 4  ;;  %s882_s21 = smov [#allocation2]   ;;  %s32_s20 = int_to_ptr.hbm [resolvable:$true] %s31_s20 }
   0x3   :  { %s33_s22 = sshll.u32 %s882_s21, 4  ;;  %s58_s25 = sshll.u32 %s1320_s10, 4  ;;  %s34_s22 = int_to_ptr.vmem [resolvable:$true] %s33_s22  ;;  %s59_s25 = int_to_ptr.hbm [resolvable:$true] %s58_s25 }
   0x4   :  { %s883_s26 = smov 128   ;;  %s884_s27 = smov 8  }
   0x5   :  { %39 = dma.hbm_to_vmem [thread:$0]  %s32_s20, 8192, %s34_s22, [#allocation3], %s883_s26, %s883_s26, %s884_s27  }
   0x6   :  { %s885_s28 = smov [#allocation5]  }
   0x7   :  { %s60_s29 = sshll.u32 %s885_s28, 4  ;;  %s61_s29 = int_to_ptr.vmem [resolvable:$true] %s60_s29 }
   0x8   :  { %66 = dma.hbm_to_vmem [thread:$0]  %s59_s25, 4096, %s61_s29, [#allocation6], %s883_s26, %s883_s26, %s884_s27  }
   0x9   :  { %876 = dma.done.wait [#allocation3], 8192  }
   0xa   :  { %877 = vsyncadd [#allocation3], 4294959104 }
   0xb   :  { %878 = dma.done.wait [#allocation6], 4096  }
   0xc   :  { %879 = vsyncadd [#allocation6], 4294963200  ;;  %v134_v0 = vld [vmem:[#allocation2 + $0x178] sm:$0xff]  ;;  %v133_v1 = vld [vmem:[#allocation2 + $0x170] sm:$0xff]  ;;  %vm231_vm0 = vcmask 64512   ;;  %vm666_vm5 = vcmask 1045504  }
   0xd   :  { %v150_v2 = vld [vmem:[#allocation2 + $0x1f8] sm:$0xff]  ;;  %191 = vmatpush.msra.mxu2 %v134_v0  ;;  %v132_v5 = vld [vmem:[#allocation2 + $0x168] sm:$0xff]  ;;  %v149_v6 = vld [vmem:[#allocation2 + $0x1f0] sm:$0xff]  ;;  %vm499_vm11 = vcmask 1040384   ;;  %vm662_vm15 = vcmask 48128  }
   0xe   :  { %211 = vmatpush.msra.mxu3 %v150_v2  ;;  %v102_v3 = vld [vmem:[#allocation2 + $0x78] sm:$0xff]  ;;  %v101_v7 = vld [vmem:[#allocation2 + $0x70] sm:$0xff]  ;;  %v148_v9 = vld [vmem:[#allocation2 + $0x1e8] sm:$0xff] }
   0xf   :  { %v118_v4 = vld [vmem:[#allocation2 + $0xf8] sm:$0xff]  ;;  %151 = vmatpush.msra.mxu0 %v102_v3  ;;  %v117_v8 = vld [vmem:[#allocation2 + $0xf0] sm:$0xff]  ;;  %192 = vmatpush.msra.mxu2 %v133_v1  ;;  %v100_v10 = vld [vmem:[#allocation2 + $0x68] sm:$0xff] }
  0x10   :  { %171 = vmatpush.msra.mxu1 %v118_v4  ;;  %212 = vmatpush.msra.mxu3 %v149_v6  ;;  %v131_v11 = vld [vmem:[#allocation2 + $0x160] sm:$0xff]  ;;  %v116_v12 = vld [vmem:[#allocation2 + $0xe8] sm:$0xff]  ;;  %v130_v16 = vld [vmem:[#allocation2 + $0x158] sm:$0xff] }
  0x11   :  { %152 = vmatpush.msra.mxu0 %v101_v7  ;;  %v147_v13 = vld [vmem:[#allocation2 + $0x1e0] sm:$0xff]  ;;  %193 = vmatpush.msra.mxu2 %v132_v5  ;;  %v146_v17 = vld [vmem:[#allocation2 + $0x1d8] sm:$0xff]  ;;  %v129_v20 = vld [vmem:[#allocation2 + $0x150] sm:$0xff] }
  0x12   :  { %172 = vmatpush.msra.mxu1 %v117_v8  ;;  %213 = vmatpush.msra.mxu3 %v148_v9  ;;  %v99_v14 = vld [vmem:[#allocation2 + $0x60] sm:$0xff]  ;;  %v98_v18 = vld [vmem:[#allocation2 + $0x58] sm:$0xff]  ;;  %v145_v21 = vld [vmem:[#allocation2 + $0x1d0] sm:$0xff] }
  0x13   :  { %v115_v15 = vld [vmem:[#allocation2 + $0xe0] sm:$0xff]  ;;  %153 = vmatpush.msra.mxu0 %v100_v10  ;;  %194 = vmatpush.msra.mxu2 %v131_v11  ;;  %v114_v19 = vld [vmem:[#allocation2 + $0xd8] sm:$0xff]  ;;  %v97_v22 = vld [vmem:[#allocation2 + $0x50] sm:$0xff] }
  0x14   :  { %173 = vmatpush.msra.mxu1 %v116_v12  ;;  %214 = vmatpush.msra.mxu3 %v147_v13  ;;  %v113_v23 = vld [vmem:[#allocation2 + $0xd0] sm:$0xff]  ;;  %v128_v24 = vld [vmem:[#allocation2 + $0x148] sm:$0xff]  ;;  %v127_v28 = vld [vmem:[#allocation2 + $0x140] sm:$0xff]  ;;  %v886_v12 = vmov 1.0  }
  0x15   :  { %154 = vmatpush.msra.mxu0 %v99_v14  ;;  %195 = vmatpush.msra.mxu2 %v130_v16  ;;  %v144_v25 = vld [vmem:[#allocation2 + $0x1c8] sm:$0xff]  ;;  %v143_v29 = vld [vmem:[#allocation2 + $0x1c0] sm:$0xff]  ;;  %v126_v32 = vld [vmem:[#allocation2 + $0x138] sm:$0xff] }
  0x16   :  { %174 = vmatpush.msra.mxu1 %v115_v15  ;;  %215 = vmatpush.msra.mxu3 %v146_v17  ;;  %v96_v26 = vld [vmem:[#allocation2 + $0x48] sm:$0xff]  ;;  %v95_v30 = vld [vmem:[#allocation2 + $0x40] sm:$0xff]  ;;  %v142_v33 = vld [vmem:[#allocation2 + $0x1b8] sm:$0xff] }
  0x17   :  { %155 = vmatpush.msra.mxu0 %v98_v18  ;;  %196 = vmatpush.msra.mxu2 %v129_v20  ;;  %v112_v27 = vld [vmem:[#allocation2 + $0xc8] sm:$0xff]  ;;  %v111_v31 = vld [vmem:[#allocation2 + $0xc0] sm:$0xff]  ;;  %v94_v34 = vld [vmem:[#allocation2 + $0x38] sm:$0xff] }
  0x18   :  { %175 = vmatpush.msra.mxu1 %v114_v19  ;;  %216 = vmatpush.msra.mxu3 %v145_v21  ;;  %v110_v35 = vld [vmem:[#allocation2 + $0xb8] sm:$0xff]  ;;  %v125_v36 = vld [vmem:[#allocation2 + $0x130] sm:$0xff]  ;;  %v124_v40 = vld [vmem:[#allocation2 + $0x128] sm:$0xff] }
  0x19   :  { %156 = vmatpush.msra.mxu0 %v97_v22  ;;  %197 = vmatpush.msra.mxu2 %v128_v24  ;;  %v141_v37 = vld [vmem:[#allocation2 + $0x1b0] sm:$0xff]  ;;  %v140_v41 = vld [vmem:[#allocation2 + $0x1a8] sm:$0xff]  ;;  %v123_v44 = vld [vmem:[#allocation2 + $0x120] sm:$0xff] }
  0x1a   :  { %176 = vmatpush.msra.mxu1 %v113_v23  ;;  %217 = vmatpush.msra.mxu3 %v144_v25  ;;  %v93_v38 = vld [vmem:[#allocation2 + $0x30] sm:$0xff]  ;;  %v92_v42 = vld [vmem:[#allocation2 + $0x28] sm:$0xff]  ;;  %v139_v45 = vld [vmem:[#allocation2 + $0x1a0] sm:$0xff] }
  0x1b   :  { %157 = vmatpush.msra.mxu0 %v96_v26  ;;  %198 = vmatpush.msra.mxu2 %v127_v28  ;;  %v109_v39 = vld [vmem:[#allocation2 + $0xb0] sm:$0xff]  ;;  %v108_v43 = vld [vmem:[#allocation2 + $0xa8] sm:$0xff]  ;;  %v122_v46 = vld [vmem:[#allocation2 + $0x118] sm:$0xff] }
  0x1c   :  { %177 = vmatpush.msra.mxu1 %v112_v27  ;;  %218 = vmatpush.msra.mxu3 %v143_v29  ;;  %v91_v47 = vld [vmem:[#allocation2 + $0x20] sm:$0xff]  ;;  %v138_v49 = vld [vmem:[#allocation2 + $0x198] sm:$0xff]  ;;  %v121_v52 = vld [vmem:[#allocation2 + $0x110] sm:$0xff] }
  0x1d   :  { %158 = vmatpush.msra.mxu0 %v95_v30  ;;  %199 = vmatpush.msra.mxu2 %v126_v32  ;;  %v107_v48 = vld [vmem:[#allocation2 + $0xa0] sm:$0xff]  ;;  %v90_v50 = vld [vmem:[#allocation2 + $0x18] sm:$0xff]  ;;  %v137_v53 = vld [vmem:[#allocation2 + $0x190] sm:$0xff] }
  0x1e   :  { %178 = vmatpush.msra.mxu1 %v111_v31  ;;  %219 = vmatpush.msra.mxu3 %v142_v33  ;;  %v106_v51 = vld [vmem:[#allocation2 + $0x98] sm:$0xff]  ;;  %v89_v54 = vld [vmem:[#allocation2 + $0x10] sm:$0xff]  ;;  %v120_v56 = vld [vmem:[#allocation2 + $0x108] sm:$0xff] }
  0x1f   :  { %159 = vmatpush.msra.mxu0 %v94_v34  ;;  %200 = vmatpush.msra.mxu2 %v125_v36  ;;  %v105_v55 = vld [vmem:[#allocation2 + $0x90] sm:$0xff]  ;;  %v136_v57 = vld [vmem:[#allocation2 + $0x188] sm:$0xff]  ;;  %v119_v60 = vld [vmem:[#allocation2 + $0x100] sm:$0xff] }
  0x20   :  { %179 = vmatpush.msra.mxu1 %v110_v35  ;;  %220 = vmatpush.msra.mxu3 %v141_v37  ;;  %v88_v58 = vld [vmem:[#allocation2 + $0x8] sm:$0xff]  ;;  %v135_v61 = vld [vmem:[#allocation2 + $0x180] sm:$0xff]  ;;  %v85_v62 = vld [vmem:[%s1310_s0 + $0x10] sm:$0xff] }
  0x21   :  { %160 = vmatpush.msra.mxu0 %v93_v38  ;;  %201 = vmatpush.msra.mxu2 %v124_v40  ;;  %v104_v59 = vld [vmem:[#allocation2 + $0x88] sm:$0xff]  ;;  %v86_v63 = vld [vmem:[%s1310_s0 + $0x18] sm:$0xff]  ;;  %v87_v0 = vld [vmem:[#allocation2] sm:$0xff] }
  0x22   :  { %180 = vmatpush.msra.mxu1 %v109_v39  ;;  %221 = vmatpush.msra.mxu3 %v140_v41  ;;  %v103_v1 = vld [vmem:[#allocation2 + $0x80] sm:$0xff]  ;;  %v84_v3 = vld [vmem:[%s1310_s0 + $0x8] sm:$0xff]  ;;  %v338_v13 = vld [vmem:[%s1315_s5 + $0xf0] sm:$0xff] }
  0x23   :  { %161 = vmatpush.msra.mxu0 %v92_v42  ;;  %202 = vmatpush.msra.mxu2 %v123_v44  ;;  %v83_v2 = vld [vmem:[%s1310_s0] sm:$0xff]  ;;  %v339_v14 = vld [vmem:[%s1315_s5 + $0xf8] sm:$0xff]  ;;  %v337_v16 = vld [vmem:[%s1315_s5 + $0xe8] sm:$0xff] }
  0x24   :  { %181 = vmatpush.msra.mxu1 %v108_v43  ;;  %222 = vmatpush.msra.mxu3 %v139_v45  ;;  %v336_v15 = vld [vmem:[%s1315_s5 + $0xe0] sm:$0xff]  ;;  %v334_v17 = vld [vmem:[%s1315_s5 + $0xd0] sm:$0xff]  ;;  %v335_v18 = vld [vmem:[%s1315_s5 + $0xd8] sm:$0xff] }
  0x25   :  { %162 = vmatpush.msra.mxu0 %v91_v47  ;;  %203 = vmatpush.msra.mxu2 %v122_v46  ;;  %v332_v19 = vld [vmem:[%s1315_s5 + $0xc0] sm:$0xff]  ;;  %v333_v20 = vld [vmem:[%s1315_s5 + $0xc8] sm:$0xff]  ;;  %v330_v21 = vld [vmem:[%s1315_s5 + $0xb0] sm:$0xff] }
  0x26   :  { %182 = vmatpush.msra.mxu1 %v107_v48  ;;  %223 = vmatpush.msra.mxu3 %v138_v49  ;;  %v331_v22 = vld [vmem:[%s1315_s5 + $0xb8] sm:$0xff]  ;;  %v328_v23 = vld [vmem:[%s1315_s5 + $0xa0] sm:$0xff]  ;;  %v329_v24 = vld [vmem:[%s1315_s5 + $0xa8] sm:$0xff] }
  0x27   :  { %163 = vmatpush.msra.mxu0 %v90_v50  ;;  %204 = vmatpush.msra.mxu2 %v121_v52  ;;  %v326_v25 = vld [vmem:[%s1315_s5 + $0x90] sm:$0xff]  ;;  %v327_v26 = vld [vmem:[%s1315_s5 + $0x98] sm:$0xff]  ;;  %v324_v27 = vld [vmem:[%s1315_s5 + $0x80] sm:$0xff] }
  0x28   :  { %183 = vmatpush.msra.mxu1 %v106_v51  ;;  %224 = vmatpush.msra.mxu3 %v137_v53  ;;  %v325_v28 = vld [vmem:[%s1315_s5 + $0x88] sm:$0xff]  ;;  %v322_v30 = vld [vmem:[%s1315_s5 + $0x70] sm:$0xff]  ;;  %v323_v31 = vld [vmem:[%s1315_s5 + $0x78] sm:$0xff] }
  0x29   :  { %164 = vmatpush.msra.mxu0 %v89_v54  ;;  %205 = vmatpush.msra.mxu2 %v120_v56  ;;  %v320_v32 = vld [vmem:[%s1315_s5 + $0x60] sm:$0xff]  ;;  %v321_v33 = vld [vmem:[%s1315_s5 + $0x68] sm:$0xff]  ;;  %v318_v34 = vld [vmem:[%s1315_s5 + $0x50] sm:$0xff] }
  0x2a   :  { %184 = vmatpush.msra.mxu1 %v105_v55  ;;  %225 = vmatpush.msra.mxu3 %v136_v57  ;;  %v319_v35 = vld [vmem:[%s1315_s5 + $0x58] sm:$0xff]  ;;  %v316_v36 = vld [vmem:[%s1315_s5 + $0x40] sm:$0xff]  ;;  %v317_v37 = vld [vmem:[%s1315_s5 + $0x48] sm:$0xff] }
  0x2b   :  { %165 = vmatpush.msra.mxu0 %v88_v58  ;;  %206 = vmatpush.msra.mxu2 %v119_v60  ;;  %v314_v39 = vld [vmem:[%s1315_s5 + $0x30] sm:$0xff]  ;;  %v315_v40 = vld [vmem:[%s1315_s5 + $0x38] sm:$0xff]  ;;  %v312_v42 = vld [vmem:[%s1315_s5 + $0x20] sm:$0xff] }
  0x2c   :  { %185 = vmatpush.msra.mxu1 %v104_v59  ;;  %226 = vmatpush.msra.mxu3 %v135_v61  ;;  %v313_v43 = vld [vmem:[%s1315_s5 + $0x28] sm:$0xff]  ;;  %v310_v46 = vld [vmem:[%s1315_s5 + $0x10] sm:$0xff]  ;;  %v311_v47 = vld [vmem:[%s1315_s5 + $0x18] sm:$0xff] }
  0x2d   :  { %207 = vmatmul.f32.vlgmr.msra.gmra.mxu2 %v85_v62  ;;  %227 = vmatmul.f32.vlgmr.msra.gmra.mxu3 %v86_v63  ;;  %v308_v49 = vld [vmem:[%s1315_s5] sm:$0xff]  ;;  %v309_v50 = vld [vmem:[%s1315_s5 + $0x8] sm:$0xff] }
  0x2e   :  { %166 = vmatpush.msra.mxu0 %v87_v0  ;;  %186 = vmatpush.msra.mxu1 %v103_v1  ;;  %v276_v59 = vld [vmem:[%s1313_s3] sm:$0x1] }
  0x2f   :  { %167 = vmatmul.f32.vlgmr.msra.gmra.mxu0 %v83_v2  ;;  %187 = vmatmul.f32.vlgmr.msra.gmra.mxu1 %v84_v3  ;;  %v277_v62 = vld [vmem:[%s1314_s4] sm:$0x1] }
  0x30   :  { %340 = vmatpush.msrb.mxu2 %v338_v13  ;;  %360 = vmatpush.msrb.mxu3 %v339_v14  ;;  %v547_v14 = vld [vmem:[%s1318_s8 + $0x78] sm:$0xff] }
  0x32   :  { %341 = vmatpush.msrb.mxu2 %v336_v15  ;;  %361 = vmatpush.msrb.mxu3 %v337_v16  ;;  %v563_v15 = vld [vmem:[%s1318_s8 + $0xf8] sm:$0xff] }
  0x33   :  { %v580_v16 = vld [vmem:[#allocation5 + $0x78] sm:$0xff] }
  0x34   :  { %342 = vmatpush.msrb.mxu2 %v334_v17  ;;  %362 = vmatpush.msrb.mxu3 %v335_v18 }
  0x36   :  { %343 = vmatpush.msrb.mxu2 %v332_v19  ;;  %363 = vmatpush.msrb.mxu3 %v333_v20  ;;  %v562_v20 = vld [vmem:[%s1318_s8 + $0xf0] sm:$0xff] }
  0x38   :  { %344 = vmatpush.msrb.mxu2 %v330_v21  ;;  %364 = vmatpush.msrb.mxu3 %v331_v22  ;;  %v579_v21 = vld [vmem:[#allocation5 + $0x70] sm:$0xff] }
  0x3a   :  { %345 = vmatpush.msrb.mxu2 %v328_v23  ;;  %365 = vmatpush.msrb.mxu3 %v329_v24  ;;  %v545_v23 = vld [vmem:[%s1318_s8 + $0x68] sm:$0xff] }
  0x3b   :  { %v561_v24 = vld [vmem:[%s1318_s8 + $0xe8] sm:$0xff] }
  0x3c   :  { %346 = vmatpush.msrb.mxu2 %v326_v25  ;;  %366 = vmatpush.msrb.mxu3 %v327_v26  ;;  %v578_v25 = vld [vmem:[#allocation5 + $0x68] sm:$0xff] }
  0x3e   :  { %347 = vmatpush.msrb.mxu2 %v324_v27  ;;  %367 = vmatpush.msrb.mxu3 %v325_v28  ;;  %v544_v27 = vld [vmem:[%s1318_s8 + $0x60] sm:$0xff] }
  0x3f   :  { %v560_v28 = vld [vmem:[%s1318_s8 + $0xe0] sm:$0xff] }
  0x40   :  { %348 = vmatpush.msrb.mxu2 %v322_v30  ;;  %368 = vmatpush.msrb.mxu3 %v323_v31  ;;  %v543_v31 = vld [vmem:[%s1318_s8 + $0x58] sm:$0xff] }
  0x42   :  { %349 = vmatpush.msrb.mxu2 %v320_v32  ;;  %369 = vmatpush.msrb.mxu3 %v321_v33  ;;  %v559_v32 = vld [vmem:[%s1318_s8 + $0xd8] sm:$0xff] }
  0x43   :  { %v576_v33 = vld [vmem:[#allocation5 + $0x58] sm:$0xff] }
  0x44   :  { %350 = vmatpush.msrb.mxu2 %v318_v34  ;;  %370 = vmatpush.msrb.mxu3 %v319_v35  ;;  %v542_v35 = vld [vmem:[%s1318_s8 + $0x50] sm:$0xff] }
  0x46   :  { %351 = vmatpush.msrb.mxu2 %v316_v36  ;;  %371 = vmatpush.msrb.mxu3 %v317_v37  ;;  %v558_v36 = vld [vmem:[%s1318_s8 + $0xd0] sm:$0xff] }
  0x47   :  { %v575_v37 = vld [vmem:[#allocation5 + $0x50] sm:$0xff] }
  0x48   :  { %352 = vmatpush.msrb.mxu2 %v314_v39  ;;  %372 = vmatpush.msrb.mxu3 %v315_v40  ;;  %v557_v39 = vld [vmem:[%s1318_s8 + $0xc8] sm:$0xff] }
  0x49   :  { %v574_v40 = vld [vmem:[#allocation5 + $0x48] sm:$0xff] }
  0x4a   :  { %353 = vmatpush.msrb.mxu2 %v312_v42  ;;  %373 = vmatpush.msrb.mxu3 %v313_v43  ;;  %v540_v42 = vld [vmem:[%s1318_s8 + $0x40] sm:$0xff] }
  0x4b   :  { %v556_v43 = vld [vmem:[%s1318_s8 + $0xc0] sm:$0xff] }
  0x4c   :  { %354 = vmatpush.msrb.mxu2 %v310_v46  ;;  %374 = vmatpush.msrb.mxu3 %v311_v47  ;;  %v555_v46 = vld [vmem:[%s1318_s8 + $0xb8] sm:$0xff] }
  0x4e   :  { %355 = vmatpush.msrb.mxu2 %v308_v49  ;;  %375 = vmatpush.msrb.mxu3 %v309_v50 }
  0x50   :  { %690 = vmatpush.msra.mxu3 %v580_v16  ;;  %v548_v16 = vld [vmem:[%s1318_s8 + $0x80] sm:$0xff] }
  0x52   :  { %691 = vmatpush.msra.mxu3 %v579_v21  ;;  %v596_v21 = vld [vmem:[#allocation5 + $0xf8] sm:$0xff] }
  0x54   :  { %692 = vmatpush.msra.mxu3 %v578_v25 }
  0xac   :  { %v168_v4 = vpop.f32.mrf.mxu0  ;;  %v188_v5 = vpop.f32.mrf.mxu1 }
  0xad   :  { %v189_v6 = vadd.f32 %v188_v5, %v168_v4 }
  0xb0   :  { %v208_v7 = vpop.f32.mrf.mxu2  ;;  %v228_v8 = vpop.f32.mrf.mxu3 }
  0xb1   :  { %v209_v9 = vadd.f32 %v208_v7, %v189_v6 }
  0xb3   :  { %v986_v10 = vadd.f32 %v228_v8, %v209_v9 }
  0xb5   :  { %v255_v11 = vmul.f32 %v986_v10, %v986_v10  ;;  %250 = vmatpush.msrb.mxu1 %v986_v10 }
  0xb6   :  { %779 = vmatmul.msk.f32.vlgmr.msrb.gmra.mxu1 %vm231_vm0, %v886_v12 }
  0xb7   :  { %271 = vmatpush.msra.mxu1 %v255_v11 }
  0xbe   :  { %780 = vmatmul.msk.f32.vlgmr.msra.gmra.mxu1 %vm231_vm0, %v886_v12 }
 0x133   :  { %v252_v29 = vpop.f32.mrf.mxu1 }
 0x134   :  { %v278_v38 = vmul.f32 0.125, %v252_v29  ;;  %v577_v29 = vld [vmem:[#allocation5 + $0x60] sm:$0xff] }
 0x135   :  { %693 = vmatpush.msra.mxu3 %v577_v29 }
 0x136   :  { %v280_v44 = vmul.f32 %v278_v38, %v278_v38 }
 0x137   :  { %694 = vmatpush.msra.mxu3 %v576_v33  ;;  %v462_v33 = vld [vmem:[%s1316_s6] sm:$0x3] }
 0x139   :  { %695 = vmatpush.msra.mxu3 %v575_v37 }
 0x13b   :  { %v273_v41 = vpop.f32.mrf.mxu1  ;;  %696 = vmatpush.msra.mxu3 %v574_v40 }
 0x13c   :  { %v279_v45 = vmul.f32 0.125, %v273_v41 }
 0x13e   :  { %v281_v48 = vsub.f32 %v279_v45, %v280_v44  ;;  %v573_v44 = vld [vmem:[#allocation5 + $0x40] sm:$0xff]  ;;  %v539_v45 = vld [vmem:[%s1318_s8 + $0x38] sm:$0xff] }
 0x13f   :  { %697 = vmatpush.msra.mxu3 %v573_v44 }
 0x140   :  { %v282_v51 = vmax.f32 %v281_v48, 0.0  ;;  %v572_v48 = vld [vmem:[#allocation5 + $0x38] sm:$0xff] }
 0x141   :  { %698 = vmatpush.msra.mxu3 %v572_v48 }
 0x142   :  { %v283_v52 = vadd.f32 1e-05, %v282_v51  ;;  %v538_v51 = vld [vmem:[%s1318_s8 + $0x30] sm:$0xff] }
 0x144   :  { %796 = vrsqrt.f32 %v283_v52  ;;  %vm290_vm2 = vweird.f32 %v283_v52 }
 0x14a   :  { %v797_v53 = vpop.eup %796 }
 0x14b   :  { %v285_v54 = vmul.f32 %v797_v53, %v283_v52  ;;  %vm291_vm1 = vweird.f32 %v797_v53  ;;  %v554_v52 = vld [vmem:[%s1318_s8 + $0xb0] sm:$0xff] }
 0x14c   :  { %vm292_vm3 = vmor %vm290_vm2, %vm291_vm1 }
 0x14d   :  { %v286_v55 = vmul.f32 %v797_v53, %v285_v54 }
 0x14f   :  { %v287_v56 = vmul.f32 0.5, %v286_v55  ;;  %v537_v55 = vld [vmem:[%s1318_s8 + $0x28] sm:$0xff] }
 0x151   :  { %v288_v57 = vsub.f32 1.5, %v287_v56  ;;  %v553_v56 = vld [vmem:[%s1318_s8 + $0xa8] sm:$0xff] }
 0x153   :  { %v289_v58 = vmul.f32 %v797_v53, %v288_v57  ;;  %v570_v57 = vld [vmem:[#allocation5 + $0x28] sm:$0xff] }
 0x155   :  { %v293_v60 = vsel %vm292_vm3, %v797_v53, %v289_v58  ;;  %v571_v53 = vld [vmem:[#allocation5 + $0x30] sm:$0xff] }
 0x156   :  { %v294_v61 = vmul.f32 %v293_v60, %v276_v59  ;;  %699 = vmatpush.msra.mxu3 %v571_v53  ;;  %v536_v60 = vld [vmem:[%s1318_s8 + $0x20] sm:$0xff] }
 0x158   :  { %v295_v63 = vmul.f32 %v294_v61, %v278_v38  ;;  %v298_v0 = vperm.slane %v294_v61, 0  ;;  %v541_v38 = vld [vmem:[%s1318_s8 + $0x48] sm:$0xff]  ;;  %v552_v61 = vld [vmem:[%s1318_s8 + $0xa0] sm:$0xff]  ;;  %700 = vmatpush.msra.mxu3 %v570_v57  ;;  %v587_v57 = vld [vmem:[#allocation5 + $0xb0] sm:$0xff] }
 0x15a   :  { %v296_v1 = vsub.f32 %v277_v62, %v295_v63  ;;  %v300_v2 = vmul.f32 %v298_v0, %v986_v10  ;;  %v569_v62 = vld [vmem:[#allocation5 + $0x20] sm:$0xff]  ;;  %v535_v0 = vld [vmem:[%s1318_s8 + $0x18] sm:$0xff] }
 0x15b   :  { %701 = vmatpush.msra.mxu3 %v569_v62  ;;  %v582_v62 = vld [vmem:[#allocation5 + $0x88] sm:$0xff] }
 0x15c   :  { %v302_v3 = vperm.slane %v296_v1, 0  ;;  %v551_v1 = vld [vmem:[%s1318_s8 + $0x98] sm:$0xff] }
 0x15e   :  { %v304_v4 = vadd.f32 %v302_v3, %v300_v2  ;;  %v568_v3 = vld [vmem:[#allocation5 + $0x18] sm:$0xff] }
 0x15f   :  { %702 = vmatpush.msra.mxu3 %v568_v3  ;;  %v611_v3 = vld [vmem:[%s1323_s13 + $0x60] sm:$0xff] }
 0x160   :  { %vm305_vm4 = vcmp.gt.f32.partialorder %v304_v4, 0.0  ;;  %v306_v5 = vmul.f32 0.01, %v304_v4 }
 0x162   :  { %v307_v6 = vsel %vm305_vm4, %v304_v4, %v306_v5  ;;  %v534_v4 = vld [vmem:[%s1318_s8 + $0x10] sm:$0xff] }
 0x163   :  { %356 = vmatmul.f32.vlgmr.msrb.gmra.mxu2 %v307_v6  ;;  %376 = vmatmul.f32.vlgmr.msrb.gmra.mxu3 %v307_v6  ;;  %v550_v5 = vld [vmem:[%s1318_s8 + $0x90] sm:$0xff] }
 0x164   :  { %v567_v6 = vld [vmem:[#allocation5 + $0x10] sm:$0xff] }
 0x165   :  { %703 = vmatpush.msra.mxu3 %v567_v6 }
 0x1e6   :  { %v1098_v7 = vpop.f32.mrf.mxu2  ;;  %v1100_v8 = vpop.f32.mrf.mxu3 }
 0x1e7   :  { %v421_v9 = vmul.f32 %v1100_v8, %v1100_v8  ;;  %395 = vmatpush.msrb.mxu1 %v1098_v7  ;;  %v420_v11 = vmul.f32 %v1098_v7, %v1098_v7 }
 0x1e8   :  { %781 = vmatmul.msk.f32.vlgmr.msrb.gmra.mxu1 %vm231_vm0, %v886_v12 }
 0x1e9   :  { %415 = vmatpush.msra.mxu1 %v1100_v8  ;;  %437 = vmatpush.msrb.mxu0 %v420_v11  ;;  %v549_v11 = vld [vmem:[%s1318_s8 + $0x88] sm:$0xff] }
 0x1ea   :  { %783 = vmatmul.msk.f32.vlgmr.msrb.gmra.mxu0 %vm231_vm0, %v886_v12 }
 0x1eb   :  { %457 = vmatpush.msrb.mxu1 %v421_v9  ;;  %619 = vmatpush.msra.mxu0 %v547_v14  ;;  %v533_v9 = vld [vmem:[%s1318_s8 + $0x8] sm:$0xff] }
 0x1ec   :  { %v566_v14 = vld [vmem:[#allocation5 + $0x8] sm:$0xff] }
 0x1ed   :  { %704 = vmatpush.msra.mxu3 %v566_v14  ;;  %v608_v14 = vld [vmem:[%s1323_s13 + $0x48] sm:$0xff] }
 0x1f0   :  { %782 = vmatmul.msk.f32.vlgmr.msra.gmra.mxu1 %vm231_vm0, %v886_v12 }
 0x1f1   :  { %639 = vmatpush.msra.mxu1 %v563_v15  ;;  %v532_v15 = vld [vmem:[%s1318_s8] sm:$0xff] }
 0x1f3   :  { %640 = vmatpush.msra.mxu1 %v562_v20  ;;  %v598_v20 = vld [vmem:[%s1322_s12] sm:$0x3f] }
 0x1f4   :  { %785 = vmatpush.msk.msra.mxu2 %vm666_vm5, %v598_v20  ;;  %v606_v20 = vld [vmem:[%s1323_s13 + $0x38] sm:$0xff] }
 0x1f5   :  { %641 = vmatpush.msra.mxu1 %v561_v24 }
 0x1f6   :  { %710 = vmatpush.msrb.mxu2 %v596_v21  ;;  %v605_v21 = vld [vmem:[%s1323_s13 + $0x30] sm:$0xff] }
 0x1f7   :  { %642 = vmatpush.msra.mxu1 %v560_v28  ;;  %v593_v28 = vld [vmem:[#allocation5 + $0xe0] sm:$0xff] }
 0x1f8   :  { %784 = vmatmul.msk.f32.vlgmr.msrb.gmra.mxu1 %vm231_vm0, %v886_v12  ;;  %v546_v12 = vld [vmem:[%s1318_s8 + $0x70] sm:$0xff] }
 0x1f9   :  { %620 = vmatpush.msra.mxu0 %v546_v12  ;;  %643 = vmatpush.msra.mxu1 %v559_v32 }
 0x1fb   :  { %621 = vmatpush.msra.mxu0 %v545_v23  ;;  %644 = vmatpush.msra.mxu1 %v558_v36  ;;  %v595_v23 = vld [vmem:[#allocation5 + $0xf0] sm:$0xff] }
 0x1fc   :  { %711 = vmatpush.msrb.mxu2 %v595_v23  ;;  %v603_v23 = vld [vmem:[%s1323_s13 + $0x20] sm:$0xff] }
 0x1fd   :  { %622 = vmatpush.msra.mxu0 %v544_v27  ;;  %645 = vmatpush.msra.mxu1 %v557_v39 }
 0x1ff   :  { %623 = vmatpush.msra.mxu0 %v543_v31  ;;  %646 = vmatpush.msra.mxu1 %v556_v43 }
 0x201   :  { %624 = vmatpush.msra.mxu0 %v542_v35  ;;  %647 = vmatpush.msra.mxu1 %v555_v46 }
 0x203   :  { %625 = vmatpush.msra.mxu0 %v541_v38  ;;  %648 = vmatpush.msra.mxu1 %v554_v52 }
 0x205   :  { %626 = vmatpush.msra.mxu0 %v540_v42  ;;  %649 = vmatpush.msra.mxu1 %v553_v56  ;;  %v589_v56 = vld [vmem:[#allocation5 + $0xc0] sm:$0xff] }
 0x207   :  { %627 = vmatpush.msra.mxu0 %v539_v45  ;;  %650 = vmatpush.msra.mxu1 %v552_v61  ;;  %v583_v61 = vld [vmem:[#allocation5 + $0x90] sm:$0xff] }
 0x209   :  { %628 = vmatpush.msra.mxu0 %v538_v51  ;;  %651 = vmatpush.msra.mxu1 %v551_v1  ;;  %v613_v1 = vld [vmem:[%s1323_s13 + $0x70] sm:$0xff] }
 0x20b   :  { %629 = vmatpush.msra.mxu0 %v537_v55  ;;  %652 = vmatpush.msra.mxu1 %v550_v5  ;;  %v591_v55 = vld [vmem:[#allocation5 + $0xd0] sm:$0xff]  ;;  %v610_v5 = vld [vmem:[%s1323_s13 + $0x58] sm:$0xff] }
 0x20d   :  { %630 = vmatpush.msra.mxu0 %v536_v60  ;;  %653 = vmatpush.msra.mxu1 %v549_v11  ;;  %v584_v60 = vld [vmem:[#allocation5 + $0x98] sm:$0xff] }
 0x20f   :  { %631 = vmatpush.msra.mxu0 %v535_v0  ;;  %654 = vmatpush.msra.mxu1 %v548_v16  ;;  %v614_v0 = vld [vmem:[%s1323_s13 + $0x78] sm:$0xff]  ;;  %v607_v16 = vld [vmem:[%s1323_s13 + $0x40] sm:$0xff] }
 0x211   :  { %632 = vmatpush.msra.mxu0 %v534_v4  ;;  %v793_v4 = vld [vmem:[%s1319_s9] ss:$0 sm:$0xff]  ;;  %s768_s9 = sshll.u32 %s1325_s15, 4  ;;  %s769_s9 = int_to_ptr.hbm [resolvable:$true] %s768_s9 }
 0x213   :  { %633 = vmatpush.msra.mxu0 %v533_v9  ;;  %v609_v9 = vld [vmem:[%s1323_s13 + $0x50] sm:$0xff] }
 0x215   :  { %634 = vmatpush.msra.mxu0 %v532_v15 }
 0x217   :  { %740 = vmatpush.msrb.mxu0 %v614_v0 }
 0x219   :  { %741 = vmatpush.msrb.mxu0 %v613_v1 }
 0x265   :  { %v397_v10 = vpop.f32.mrf.mxu1 }
 0x266   :  { %v1116_v13 = vmul.f32 0.125, %v397_v10 }
 0x267   :  { %v439_v17 = vpop.f32.mrf.mxu0 }
 0x268   :  { %v468_v18 = vmul.f32 %v1116_v13, %v1116_v13  ;;  %v466_v19 = vmul.f32 0.125, %v439_v17  ;;  %v565_v17 = vld [vmem:[#allocation5] sm:$0xff] }
 0x269   :  { %705 = vmatpush.msra.mxu3 %v565_v17 }
 0x26a   :  { %v470_v22 = vsub.f32 %v466_v19, %v468_v18 }
 0x26c   :  { %v472_v26 = vmax.f32 %v470_v22, 0.0 }
 0x26d   :  { %v417_v30 = vpop.f32.mrf.mxu1 }
 0x26e   :  { %v1150_v34 = vadd.f32 1e-05, %v472_v26  ;;  %v1164_v41 = vmul.f32 0.125, %v417_v30  ;;  %v594_v26 = vld [vmem:[#allocation5 + $0xe8] sm:$0xff] }
 0x26f   :  { %712 = vmatpush.msrb.mxu2 %v594_v26  ;;  %v600_v26 = vld [vmem:[%s1323_s13 + $0x8] sm:$0xff] }
 0x270   :  { %798 = vrsqrt.f32 %v1150_v34  ;;  %v469_v49 = vmul.f32 %v1164_v41, %v1164_v41  ;;  %vm482_vm10 = vweird.f32 %v1150_v34 }
 0x271   :  { %713 = vmatpush.msrb.mxu2 %v593_v28 }
 0x275   :  { %v459_v47 = vpop.f32.mrf.mxu1 }
 0x276   :  { %v467_v50 = vmul.f32 0.125, %v459_v47  ;;  %v1193_v58 = vpop.eup %798 }
 0x277   :  { %v477_v2 = vmul.f32 %v1193_v58, %v1150_v34  ;;  %vm483_vm7 = vweird.f32 %v1193_v58  ;;  %v463_v34 = vld [vmem:[%s1317_s7] sm:$0x3] }
 0x278   :  { %v471_v54 = vsub.f32 %v467_v50, %v469_v49  ;;  %vm484_vm12 = vmor %vm482_vm10, %vm483_vm7 }
 0x279   :  { %v478_v10 = vmul.f32 %v1193_v58, %v477_v2  ;;  %v612_v2 = vld [vmem:[%s1323_s13 + $0x68] sm:$0xff] }
 0x27a   :  { %v473_v59 = vmax.f32 %v471_v54, 0.0  ;;  %742 = vmatpush.msrb.mxu0 %v612_v2 }
 0x27b   :  { %v479_v19 = vmul.f32 0.5, %v478_v10 }
 0x27c   :  { %v475_v63 = vadd.f32 1e-05, %v473_v59  ;;  %v585_v59 = vld [vmem:[#allocation5 + $0xa0] sm:$0xff]  ;;  %743 = vmatpush.msrb.mxu0 %v611_v3 }
 0x27d   :  { %v480_v24 = vsub.f32 1.5, %v479_v19 }
 0x27e   :  { %800 = vrsqrt.f32 %v475_v63  ;;  %vm492_vm8 = vweird.f32 %v475_v63  ;;  %744 = vmatpush.msrb.mxu0 %v610_v5 }
 0x27f   :  { %v481_v29 = vmul.f32 %v1193_v58, %v480_v24  ;;  %v602_v24 = vld [vmem:[%s1323_s13 + $0x18] sm:$0xff] }
 0x280   :  { %745 = vmatpush.msrb.mxu0 %v609_v9 }
 0x281   :  { %v485_v35 = vsel %vm484_vm12, %v1193_v58, %v481_v29  ;;  %v586_v58 = vld [vmem:[#allocation5 + $0xa8] sm:$0xff] }
 0x282   :  { %746 = vmatpush.msrb.mxu0 %v608_v14 }
 0x284   :  { %v801_v18 = vpop.eup %800  ;;  %747 = vmatpush.msrb.mxu0 %v607_v16 }
 0x285   :  { %v487_v12 = vmul.f32 %v801_v18, %v475_v63  ;;  %vm493_vm6 = vweird.f32 %v801_v18  ;;  %v581_v63 = vld [vmem:[#allocation5 + $0x80] sm:$0xff] }
 0x286   :  { %vm494_vm9 = vmor %vm492_vm8, %vm493_vm6  ;;  %748 = vmatpush.msrb.mxu0 %v606_v20 }
 0x287   :  { %v488_v22 = vmul.f32 %v801_v18, %v487_v12 }
 0x288   :  { %749 = vmatpush.msrb.mxu0 %v605_v21 }
 0x289   :  { %v489_v25 = vmul.f32 0.5, %v488_v22  ;;  %v604_v22 = vld [vmem:[%s1323_s13 + $0x28] sm:$0xff] }
 0x28a   :  { %750 = vmatpush.msrb.mxu0 %v604_v22 }
 0x28b   :  { %v490_v27 = vsub.f32 1.5, %v489_v25  ;;  %v601_v25 = vld [vmem:[%s1323_s13 + $0x10] sm:$0xff] }
 0x28c   :  { %751 = vmatpush.msrb.mxu0 %v603_v23 }
 0x28d   :  { %v491_v30 = vmul.f32 %v801_v18, %v490_v27  ;;  %v599_v27 = vld [vmem:[%s1323_s13] sm:$0xff]  ;;  %s887_s13 = smov [#allocation7]  }
 0x28e   :  { %752 = vmatpush.msrb.mxu0 %v602_v24  ;;  %s766_s29 = sshll.u32 %s887_s13, 4  ;;  %s767_s29 = int_to_ptr.vmem [resolvable:$true] %s766_s29 }
 0x28f   :  { %v495_v31 = vsel %vm494_vm9, %v801_v18, %v491_v30  ;;  %v531_v18 = vld [vmem:[%s1311_s1] sm:$0xff] }
 0x290   :  { %v498_v32 = vrot.slane %v495_v31, 7  ;;  %753 = vmatpush.msrb.mxu0 %v601_v25  ;;  %v794_v31 = vld [vmem:[%s1321_s11] ss:$0 sm:$0xff] }
 0x292   :  { %v500_v36 = vsel %vm499_vm11, %v485_v35, %v498_v32  ;;  %754 = vmatpush.msrb.mxu0 %v600_v26 }
 0x293   :  { %v502_v37 = vmul.f32 %v500_v36, %v462_v33 }
 0x294   :  { %755 = vmatpush.msrb.mxu0 %v599_v27 }
 0x295   :  { %v504_v38 = vperm.slane %v502_v37, 0  ;;  %v505_v39 = vperm.slane %v502_v37, 1 }
 0x297   :  { %v509_v40 = vmul.f32 %v505_v39, %v1164_v41  ;;  %v508_v42 = vmul.f32 %v504_v38, %v1116_v13  ;;  %v516_v46 = vmul.f32 %v504_v38, %v1098_v7  ;;  %v517_v48 = vmul.f32 %v505_v39, %v1100_v8  ;;  %v592_v13 = vld [vmem:[#allocation5 + $0xd8] sm:$0xff]  ;;  %v590_v7 = vld [vmem:[#allocation5 + $0xc8] sm:$0xff]  ;;  %v795_v38 = vld [vmem:[%s1324_s14] ss:$0 sm:$0xff] }
 0x298   :  { %714 = vmatpush.msrb.mxu2 %v592_v13  ;;  %v588_v8 = vld [vmem:[#allocation5 + $0xb8] sm:$0xff] }
 0x299   :  { %v512_v43 = vrot.slane %v509_v40, 7 }
 0x29a   :  { %715 = vmatpush.msrb.mxu2 %v591_v55 }
 0x29b   :  { %v513_v44 = vsel %vm499_vm11, %v508_v42, %v512_v43 }
 0x29c   :  { %v515_v45 = vsub.f32 %v463_v34, %v513_v44  ;;  %716 = vmatpush.msrb.mxu2 %v590_v7 }
 0x29e   :  { %v519_v47 = vperm.slane %v515_v45, 0  ;;  %v520_v49 = vperm.slane %v515_v45, 1  ;;  %717 = vmatpush.msrb.mxu2 %v589_v56 }
 0x2a0   :  { %v523_v50 = vadd.f32 %v519_v47, %v516_v46  ;;  %v524_v51 = vadd.f32 %v520_v49, %v517_v48  ;;  %718 = vmatpush.msrb.mxu2 %v588_v8 }
 0x2a2   :  { %vm525_vm13 = vcmp.gt.f32.partialorder %v523_v50, 0.0  ;;  %v527_v52 = vmul.f32 0.01, %v523_v50  ;;  %vm526_vm14 = vcmp.gt.f32.partialorder %v524_v51, 0.0  ;;  %v528_v41 = vmul.f32 0.01, %v524_v51  ;;  %719 = vmatpush.msrb.mxu2 %v587_v57 }
 0x2a4   :  { %v529_v53 = vsel %vm525_vm13, %v523_v50, %v527_v52  ;;  %v530_v54 = vsel %vm526_vm14, %v524_v51, %v528_v41  ;;  %720 = vmatpush.msrb.mxu2 %v586_v58 }
 0x2a5   :  { %635 = vmatmul.f32.vlgmr.msra.gmra.mxu0 %v529_v53  ;;  %655 = vmatmul.f32.vlgmr.msra.gmra.mxu1 %v530_v54 }
 0x2a6   :  { %706 = vmatmul.f32.vlgmr.msra.gmra.mxu3 %v529_v53  ;;  %721 = vmatpush.msrb.mxu2 %v585_v59 }
 0x2a8   :  { %722 = vmatpush.msrb.mxu2 %v584_v60 }
 0x2aa   :  { %723 = vmatpush.msrb.mxu2 %v583_v61 }
 0x2ac   :  { %724 = vmatpush.msrb.mxu2 %v582_v62 }
 0x2ae   :  { %725 = vmatpush.msrb.mxu2 %v581_v63 }
 0x322   :  { %v636_v6 = vpop.f32.mrf.mxu0  ;;  %v656_v10 = vpop.f32.mrf.mxu1 }
 0x323   :  { %v637_v11 = vadd.f32 %v793_v4, %v636_v6 }
 0x325   :  { %v657_v15 = vadd.f32 %v656_v10, %v637_v11 }
 0x327   :  { %v659_v17 = vmul.f32 1.442695, %v657_v15 }
 0x329   :  { %802 = vpow2.f32 %v659_v17  ;;  %v707_v29 = vpop.f32.mrf.mxu3 }
 0x32f   :  { %v803_v19 = vpop.eup %802 }
 0x330   :  { %v661_v12 = vmul.f32 %v803_v19, %v531_v18 }
 0x332   :  { %786 = vmatmul.msk.f32.vlgmr.msra.gmra.mxu2 %vm662_vm15, %v661_v12 }
 0x33a   :  { %726 = vmatmul.f32.vlgmr.msrb.gmra.mxu2 %v530_v54 }
 0x3b5   :  { %v687_v28 = vpop.f32.mrf.mxu2 }
 0x3b6   :  { %v708_v30 = vadd.f32 %v707_v29, %v687_v28 }
 0x3bd   :  { %v727_v32 = vpop.f32.mrf.mxu2 }
 0x3be   :  { %v728_v33 = vadd.f32 %v727_v32, %v708_v30 }
 0x3c0   :  { %v733_v35 = vadd.f32 %v794_v31, %v728_v33 }
 0x3c2   :  { %v735_v36 = vmul.f32 0.01, %v733_v35  ;;  %vm734_vm0 = vcmp.gt.f32.partialorder %v733_v35, 0.0 }
 0x3c4   :  { %v736_v37 = vsel %vm734_vm0, %v733_v35, %v735_v36 }
 0x3c5   :  { %756 = vmatmul.f32.vlgmr.msrb.gmra.mxu0 %v736_v37 }
 0x442   :  { %v757_v39 = vpop.f32.mrf.mxu0 }
 0x443   :  { %v758_v40 = vadd.f32 %v795_v38, %v757_v39 }
 0x445   :  { %760 = vst.msk [vmem:[#allocation7] sm:$0xff] %vm662_vm15, %v758_v40 }
 0x446   :  { %771 = dma.vmem_to_hbm [thread:$0]  %s767_s29, 128, %s769_s9, [#allocation4]  }
 0x447   :  { %880 = dma.done.wait [#allocation4], 128  }
 0x448   :  { %881 = vsyncadd [#allocation4], 4294967168 }
 0x449   :  { %776 = vsyncpa [#allocation3], 1 }
 0x44a   :  { %777 = vsyncpa [#allocation6], 1 }
 0x44b   :  { %778 = vsyncpa [#allocation4], 1 }

</bundles_post_ra>
